<compile_context>
chip_gen: v7x
topology: tpu7x:2x2x1
jax: 0.10.0
libtpu: 0.0.40
codegen_flags: <defaults>
</compile_context>

<pallas_src>
import jax
import jax.numpy as jnp
from jax.experimental import pallas as pl
from jax.experimental.pallas import tpu as pltpu

EPS = 1e-10
PAD_LOGIT = 1e-16        # torch.full((B, D), 1e-16) fill for padded doc slots
LN2 = 0.6931471805599453


def _plistmle_kernel(x_ref, w_ref, b_ref, tri_ref, ranks_ref, mask_ref, o_ref):
    """One batch tile of TB queries.

    x_ref     : (TB, D, H) feat dtype -- pair features (padded rows zero)
    w_ref     : (1, 1, H)  f32        -- scoring head weight        (resident)
    b_ref     : (1, 1)     f32        -- scoring head bias          (resident)
    tri_ref   : (D, D)     f32        -- tri[j, i] = 1 iff j >= i   (resident)
    ranks_ref : (1, D)     f32        -- 0 .. D-1                   (resident)
    mask_ref  : (TB, D)    f32        -- 1.0 where a real document exists
    o_ref     : (TB, 1)    f32        -- per-query losses for this tile
    """
    # --- CrossEncoder stand-in: linear scoring head ---------------------------
    # VPU multiply + lane reduce (no in-kernel relayout); f32 accumulation.
    x = x_ref[...].astype(jnp.float32)                               # (TB, D, H)
    logits = jnp.sum(x * w_ref[...], axis=-1) + b_ref[0, 0]          # (TB, D) f32

    mask = mask_ref[...]                                             # (TB, D)

    # logits_matrix = full(1e-16); logits_matrix[valid] = logits
    logits = jnp.where(mask > 0, logits, jnp.float32(PAD_LOGIT))

    # --- ListMLE core: exp -> reverse cumsum -> log-prob ----------------------
    # Stabilized with a per-row max (cancels in logits - log(cumsum) up to the
    # negligible eps term, prevents exp overflow for large logits).
    row_max = jnp.max(logits, axis=1, keepdims=True)                 # (TB, 1)
    scores = jnp.exp(logits - row_max)                               # (TB, D) EUP
    # cumsum[b, i] = sum_{j >= i} scores[b, j]  via resident tri matmul (MXU).
    cumsum = jnp.dot(scores, tri_ref[...],
                     preferred_element_type=jnp.float32)             # (TB, D)
    log_probs = (logits - row_max) - jnp.log(cumsum + jnp.float32(EPS))

    # --- PListMLELambdaWeight: 2^(num_docs - rank) - 1, masked, normalized ----
    num_docs = jnp.sum(mask, axis=1, keepdims=True)                  # (TB, 1)
    weights = (jnp.exp((num_docs - ranks_ref[...]) * jnp.float32(LN2))
               - 1.0) * mask                                         # (TB, D)
    wsum = jnp.sum(weights, axis=1, keepdims=True) + jnp.float32(EPS)
    weights = weights / wsum                                         # (TB, 1) div: negligible

    log_probs = jnp.where(mask > 0, log_probs * weights, 0.0)

    # Per-query losses for this tile; fully padded queries come out exactly 0.
    o_ref[...] = -jnp.sum(log_probs, axis=1, keepdims=True)


def _round_up(x, m):
    return (x + m - 1) // m * m


def _vmem_capacity_bytes():
    try:
        return int(pltpu.get_tpu_info().vmem_capacity_bytes)
    except Exception:
        return 64 * 1024 * 1024          # conservative default (v7x-sized)


def plistmle_loss(features, weight, bias, mask):
    """features: (B, D, H) any float dtype (bf16 recommended);
    weight: (H, 1); bias: (1, 1); mask: (B, D) bool."""
    B, D, H = features.shape
    if B == 0 or D == 0:
        return jnp.float32(0.0)
    feat_dtype = features.dtype
    itemsize = jnp.dtype(feat_dtype).itemsize

    # --- generation-aware batch tile -----------------------------------------
    vmem = _vmem_capacity_bytes()            # 128 MiB v5e/v6e, 64 MiB v7x
    tile_budget = vmem // 16                 # leaves room for 2x DMA buffers
    tb = tile_budget // (D * H * itemsize)   # + in-kernel f32 working copies
    tb = max(8, min(int(tb), 1024))
    tb = (tb // 8) * 8                       # keep (8, 128) block tiling happy
    tb = min(tb, _round_up(B, 8))
    b_pad = _round_up(B, tb)
    num_tiles = b_pad // tb

    # --- host-side layout prep (cheap / one-off; no upcast of features) ------
    x = features
    mask_f = mask.astype(jnp.float32)
    if b_pad != B:
        x = jnp.pad(x, ((0, b_pad - B), (0, 0), (0, 0)))
        mask_f = jnp.pad(mask_f, ((0, b_pad - B), (0, 0)))
    w = weight.reshape(1, 1, H).astype(jnp.float32)
    b = bias.reshape(1, 1).astype(jnp.float32)
    tri = (jnp.arange(D)[:, None] >= jnp.arange(D)[None, :]).astype(jnp.float32)
    ranks = jnp.arange(D, dtype=jnp.float32).reshape(1, D)

    per_query = pl.pallas_call(
        _plistmle_kernel,
        out_shape=jax.ShapeDtypeStruct((b_pad, 1), jnp.float32),
        grid=(num_tiles,),
        in_specs=[
            pl.BlockSpec((tb, D, H), lambda i: (i, 0, 0)),   # features (streamed)
            pl.BlockSpec((1, 1, H), lambda i: (0, 0, 0)),    # weight   (resident)
            pl.BlockSpec((1, 1), lambda i: (0, 0)),          # bias     (resident)
            pl.BlockSpec((D, D), lambda i: (0, 0)),          # tri      (resident)
            pl.BlockSpec((1, D), lambda i: (0, 0)),          # ranks    (resident)
            pl.BlockSpec((tb, D), lambda i: (i, 0)),         # mask     (streamed)
        ],
        out_specs=pl.BlockSpec((tb, 1), lambda i: (i, 0)),
        compiler_params=pltpu.CompilerParams(
            dimension_semantics=("parallel",),
            vmem_limit_bytes=int(min(vmem // 2, 96 * 1024 * 1024)),
        ),
    )(x, w, b, tri, ranks, mask_f)

    # TODO(synk): the torch module early-returns 0.0 when the mask is all-False
    # or when every per-query loss is exactly zero; those data-dependent
    # degenerate branches are handled (if needed) in glue code, not in-kernel.
    return jnp.sum(per_query) / jnp.float32(B)   # padded queries contribute 0


def plistmle_loss_ref(features, weight, bias, mask):
    """Pure-JAX reference mirroring the PyTorch module (respect_input_order=True,
    Identity activation, default PListMLELambdaWeight) -- unstabilized, faithful."""
    B, D, H = features.shape
    x = features.astype(jnp.float32)
    w = weight.reshape(H).astype(jnp.float32)
    logits = jnp.einsum('bdh,h->bd', x, w) + bias.reshape(1, 1)[0, 0].astype(jnp.float32)
    m = mask.astype(jnp.float32)
    logits = jnp.where(mask, logits, jnp.float32(PAD_LOGIT))
    scores = jnp.exp(logits)
    cumsum_scores = jnp.flip(jnp.cumsum(jnp.flip(scores, 1), 1), 1)
    log_probs = logits - jnp.log(cumsum_scores + EPS)
    num_docs = jnp.sum(m, axis=1, keepdims=True)
    ranks = jnp.arange(D, dtype=jnp.float32)[None, :]
    lw = (jnp.exp2(num_docs - ranks) - 1.0) * m
    lw = lw / (jnp.sum(lw, axis=1, keepdims=True) + EPS)
    log_probs = jnp.where(mask, log_probs * lw, 0.0)
    return jnp.mean(-jnp.sum(log_probs, axis=1))


if __name__ == "__main__":
    key = jax.random.PRNGKey(0)
    B, D, H = 2, 8, 32            # queries, max docs per query, hidden size
    k_x, k_w = jax.random.split(key, 2)

    # Synthetic (query, doc) pair features in bf16 (the streamed dtype) and a
    # deterministic linear scoring head standing in for the CrossEncoder.
    features = jax.random.normal(k_x, (B, D, H), dtype=jnp.float32).astype(jnp.bfloat16)
    weight = 0.1 * jax.random.normal(k_w, (H, 1), dtype=jnp.float32)
    bias = 0.05 * jnp.ones((1, 1), dtype=jnp.float32)

    # Variable number of docs per query (listwise, ragged -> mask), e.g. [8, 5].
    docs_per_query = jnp.array([8, 5], dtype=jnp.int32)
    mask = jnp.arange(D)[None, :] < docs_per_query[:, None]     # (B, D) bool

    loss = plistmle_loss(features, weight, bias, mask)
    loss = jax.block_until_ready(loss)

    ref = plistmle_loss_ref(features, weight, bias, mask)
    assert jnp.allclose(loss, ref, rtol=5e-3, atol=5e-3), (loss, ref)

    print("KERNEL_OK")
</pallas_src>

<mosaic_0001>
module attributes {stable_mosaic.version = 11 : i64} {
  func.func @_plistmle_kernel(%arg0: i32, %arg1: memref<8x8x32xbf16, #tpu.memory_space<vmem>>, %arg2: memref<1x1x32xf32, #tpu.memory_space<vmem>>, %arg3: memref<1x1xf32, #tpu.memory_space<vmem>>, %arg4: memref<8x8xf32, #tpu.memory_space<vmem>>, %arg5: memref<1x8xf32, #tpu.memory_space<vmem>>, %arg6: memref<8x8xf32, #tpu.memory_space<vmem>>, %arg7: memref<8x1xf32, #tpu.memory_space<vmem>>) attributes {dimension_semantics = [#tpu.dimension_semantics<parallel>], iteration_bounds = array<i64: 1>, scalar_prefetch = 0 : i64, scratch_operands = 0 : i64, tpu.core_type = #tpu.core_type<tc>, window_params = [{transform_indices = @transform_0, window_bounds = array<i64: 8, 8, 32>}, {pipeline_mode = #tpu.pipeline_mode<synchronous>, transform_indices = @transform_1, window_bounds = array<i64: 1, 1, 32>}, {pipeline_mode = #tpu.pipeline_mode<synchronous>, transform_indices = @transform_2, window_bounds = array<i64: 1, 1>}, {pipeline_mode = #tpu.pipeline_mode<synchronous>, transform_indices = @transform_3, window_bounds = array<i64: 8, 8>}, {pipeline_mode = #tpu.pipeline_mode<synchronous>, transform_indices = @transform_4, window_bounds = array<i64: 1, 8>}, {transform_indices = @transform_5, window_bounds = array<i64: 8, 8>}, {transform_indices = @transform_6, window_bounds = array<i64: 8, 1>}]} {
    %c0 = arith.constant 0 : index
    %c0_0 = arith.constant 0 : index
    %c0_1 = arith.constant 0 : index
    %0 = vector.load %arg1[%c0, %c0_0, %c0_1] : memref<8x8x32xbf16, #tpu.memory_space<vmem>>, vector<8x8x32xbf16>
    %1 = arith.extf %0 : vector<8x8x32xbf16> to vector<8x8x32xf32>
    %c0_2 = arith.constant 0 : index
    %c0_3 = arith.constant 0 : index
    %c0_4 = arith.constant 0 : index
    %2 = vector.load %arg2[%c0_2, %c0_3, %c0_4] : memref<1x1x32xf32, #tpu.memory_space<vmem>>, vector<1x1x32xf32>
    %3 = vector.broadcast %2 : vector<1x1x32xf32> to vector<8x8x32xf32>
    %4 = arith.mulf %1, %3 : vector<8x8x32xf32>
    %cst = arith.constant dense<0.000000e+00> : vector<8x8xf32>
    %5 = vector.multi_reduction <add>, %4, %cst [2] : vector<8x8x32xf32> to vector<8x8xf32>
    %c0_5 = arith.constant 0 : index
    %c0_6 = arith.constant 0 : index
    %6 = vector.load %arg3[%c0_5, %c0_6] : memref<1x1xf32, #tpu.memory_space<vmem>>, vector<1x1xf32>
    %7 = vector.extract %6[0, 0] : f32 from vector<1x1xf32>
    %8 = vector.broadcast %7 : f32 to vector<8x8xf32>
    %9 = arith.addf %5, %8 : vector<8x8xf32>
    %c0_7 = arith.constant 0 : index
    %c0_8 = arith.constant 0 : index
    %10 = vector.load %arg6[%c0_7, %c0_8] : memref<8x8xf32, #tpu.memory_space<vmem>>, vector<8x8xf32>
    %cst_9 = arith.constant 0.000000e+00 : f32
    %11 = vector.broadcast %cst_9 : f32 to vector<8x8xf32>
    %12 = arith.cmpf ogt, %10, %11 : vector<8x8xf32>
    %cst_10 = arith.constant 1.000000e-16 : f32
    %13 = vector.broadcast %cst_10 : f32 to vector<8x8xf32>
    %14 = arith.select %12, %9, %13 : vector<8x8xi1>, vector<8x8xf32>
    %cst_11 = arith.constant dense<0xFF800000> : vector<8xf32>
    %15 = vector.multi_reduction <maximumf>, %14, %cst_11 [1] : vector<8x8xf32> to vector<8xf32>
    %16 = vector.shape_cast %15 : vector<8xf32> to vector<8x1xf32>
    %17 = vector.broadcast %16 : vector<8x1xf32> to vector<8x8xf32>
    %18 = arith.subf %14, %17 : vector<8x8xf32>
    %19 = math.exp %18 : vector<8x8xf32>
    %c0_12 = arith.constant 0 : index
    %c0_13 = arith.constant 0 : index
    %20 = vector.load %arg4[%c0_12, %c0_13] : memref<8x8xf32, #tpu.memory_space<vmem>>, vector<8x8xf32>
    %cst_14 = arith.constant dense<0.000000e+00> : vector<8x8xf32>
    %21 = tpu.matmul %19, %20, %cst_14 {dimension_numbers = #tpu.dot_dimension_numbers<[1], [0], [0], [1], [0, 0, 1, 1], [], []>} : vector<8x8xf32>, vector<8x8xf32>, vector<8x8xf32> -> vector<8x8xf32>
    %22 = vector.broadcast %16 : vector<8x1xf32> to vector<8x8xf32>
    %23 = arith.subf %14, %22 : vector<8x8xf32>
    %cst_15 = arith.constant 1.000000e-10 : f32
    %24 = vector.broadcast %cst_15 : f32 to vector<8x8xf32>
    %25 = arith.addf %21, %24 : vector<8x8xf32>
    %26 = math.log %25 : vector<8x8xf32>
    %27 = arith.subf %23, %26 : vector<8x8xf32>
    %cst_16 = arith.constant dense<0.000000e+00> : vector<8xf32>
    %28 = vector.multi_reduction <add>, %10, %cst_16 [1] : vector<8x8xf32> to vector<8xf32>
    %29 = vector.shape_cast %28 : vector<8xf32> to vector<8x1xf32>
    %c0_17 = arith.constant 0 : index
    %c0_18 = arith.constant 0 : index
    %30 = vector.load %arg5[%c0_17, %c0_18] : memref<1x8xf32, #tpu.memory_space<vmem>>, vector<1x8xf32>
    %31 = vector.broadcast %29 : vector<8x1xf32> to vector<8x8xf32>
    %32 = vector.broadcast %30 : vector<1x8xf32> to vector<8x8xf32>
    %33 = arith.subf %31, %32 : vector<8x8xf32>
    %cst_19 = arith.constant 0.693147182 : f32
    %34 = vector.broadcast %cst_19 : f32 to vector<8x8xf32>
    %35 = arith.mulf %33, %34 : vector<8x8xf32>
    %36 = math.exp %35 : vector<8x8xf32>
    %cst_20 = arith.constant 1.000000e+00 : f32
    %37 = vector.broadcast %cst_20 : f32 to vector<8x8xf32>
    %38 = arith.subf %36, %37 : vector<8x8xf32>
    %39 = arith.mulf %38, %10 : vector<8x8xf32>
    %cst_21 = arith.constant dense<0.000000e+00> : vector<8xf32>
    %40 = vector.multi_reduction <add>, %39, %cst_21 [1] : vector<8x8xf32> to vector<8xf32>
    %41 = vector.shape_cast %40 : vector<8xf32> to vector<8x1xf32>
    %cst_22 = arith.constant 1.000000e-10 : f32
    %42 = vector.broadcast %cst_22 : f32 to vector<8x1xf32>
    %43 = arith.addf %41, %42 : vector<8x1xf32>
    %44 = vector.broadcast %43 : vector<8x1xf32> to vector<8x8xf32>
    %45 = arith.divf %39, %44 : vector<8x8xf32>
    %cst_23 = arith.constant 0.000000e+00 : f32
    %46 = vector.broadcast %cst_23 : f32 to vector<8x8xf32>
    %47 = arith.cmpf ogt, %10, %46 : vector<8x8xf32>
    %48 = arith.mulf %27, %45 : vector<8x8xf32>
    %cst_24 = arith.constant 0.000000e+00 : f32
    %49 = vector.broadcast %cst_24 : f32 to vector<8x8xf32>
    %50 = arith.select %47, %48, %49 : vector<8x8xi1>, vector<8x8xf32>
    %cst_25 = arith.constant dense<0.000000e+00> : vector<8xf32>
    %51 = vector.multi_reduction <add>, %50, %cst_25 [1] : vector<8x8xf32> to vector<8xf32>
    %52 = vector.shape_cast %51 : vector<8xf32> to vector<8x1xf32>
    %cst_26 = arith.constant 0.000000e+00 : f32
    %53 = vector.broadcast %cst_26 : f32 to vector<8x1xf32>
    %54 = arith.subf %53, %52 : vector<8x1xf32>
    %c0_27 = arith.constant 0 : index
    %c0_28 = arith.constant 0 : index
    %55 = vector.load %arg7[%c0_27, %c0_28] : memref<8x1xf32, #tpu.memory_space<vmem>>, vector<8x1xf32>
    tpu.vector_store %arg7[%c0_27, %c0_28], %54 {strides = array<i32>} : memref<8x1xf32, #tpu.memory_space<vmem>>, vector<8x1xf32>,
    return
  }
  func.func @transform_0(%arg0: i32) -> (i32, i32, i32) {
    %c0_i32 = arith.constant 0 : i32
    %c0_i32_0 = arith.constant 0 : i32
    %c0_i32_1 = arith.constant 0 : i32
    return %arg0, %c0_i32, %c0_i32_0 : i32, i32, i32
  }
  func.func @transform_1(%arg0: i32) -> (i32, i32, i32) {
    %c0_i32 = arith.constant 0 : i32
    %c0_i32_0 = arith.constant 0 : i32
    %c0_i32_1 = arith.constant 0 : i32
    %c0_i32_2 = arith.constant 0 : i32
    return %c0_i32, %c0_i32_0, %c0_i32_1 : i32, i32, i32
  }
  func.func @transform_2(%arg0: i32) -> (i32, i32) {
    %c0_i32 = arith.constant 0 : i32
    %c0_i32_0 = arith.constant 0 : i32
    %c0_i32_1 = arith.constant 0 : i32
    return %c0_i32, %c0_i32_0 : i32, i32
  }
  func.func @transform_3(%arg0: i32) -> (i32, i32) {
    %c0_i32 = arith.constant 0 : i32
    %c0_i32_0 = arith.constant 0 : i32
    %c0_i32_1 = arith.constant 0 : i32
    return %c0_i32, %c0_i32_0 : i32, i32
  }
  func.func @transform_4(%arg0: i32) -> (i32, i32) {
    %c0_i32 = arith.constant 0 : i32
    %c0_i32_0 = arith.constant 0 : i32
    %c0_i32_1 = arith.constant 0 : i32
    return %c0_i32, %c0_i32_0 : i32, i32
  }
  func.func @transform_5(%arg0: i32) -> (i32, i32) {
    %c0_i32 = arith.constant 0 : i32
    %c0_i32_0 = arith.constant 0 : i32
    return %arg0, %c0_i32 : i32, i32
  }
  func.func @transform_6(%arg0: i32) -> (i32, i32) {
    %c0_i32 = arith.constant 0 : i32
    %c0_i32_0 = arith.constant 0 : i32
    return %arg0, %c0_i32 : i32, i32
  }
}

</mosaic_0001>

<bundles_post_ra>
// kernel: tpu_custom_call.1
= control target key start
LH: loop header
LB: loop body
LE: loop exit
PB: predicated region body
PF: predicated region fallthrough
CT: control target
= control target key end

     0   :  { %s446_s0 = inlined_call_operand.hbm [shape: bf16[8,8,32], index: 0, kind: input, shape index: {}]   ;;  %s447_s1 = inlined_call_operand.vmem [shape: f32[1,1,32], index: 1, kind: input, shape index: {}]   ;;  %s448_s2 = inlined_call_operand.<no memory space> [shape: f32[1,1], index: 2, kind: input, shape index: {}]   ;;  %s449_s3 = inlined_call_operand.vmem [shape: f32[8,8], index: 3, kind: input, shape index: {}]   ;;  %s450_s4 = inlined_call_operand.vmem [shape: f32[1,8], index: 4, kind: input, shape index: {}]   ;;  %s451_s5 = inlined_call_operand.vmem [shape: f32[8,8], index: 5, kind: input, shape index: {}]   ;;  %s452_s6 = inlined_call_operand.vmem [shape: f32[8,1], index: 6, kind: output, shape index: {}]  }
   0x1   :  { %v11_v0 = vstv %s448_s2 }
   0x2   :  { %12 = vst [vmem:[#allocation2] sm:$0x1] %v11_v0 }
   0x3   :  { %13 = vsyncpa [#allocation4], 0  ;;  %s354_s23 = smov [#allocation3]   ;;  %s330_s27 = scalar_lea.hbm %s446_s0, 512 }
   0x4   :  { %s19_s24 = sshll.u32 %s354_s23, 4  ;;  %p331_p0 = scmp.ne.s32.totalorder %s446_s0, %s330_s27  ;;  %s20_s24 = int_to_ptr.vmem [resolvable:$true] %s19_s24 }
   0x5   :  { %p334_p1 = scmp.lt.u32.totalorder %s330_s27, %s446_s0 }
   0x7   :  { %p336_p2 = pnand %p334_p1, %p331_p0 }
   0x9   :  { %339 = shalt.err (!%p336_p2)
}
   0xa   :  { %s340_s2 = scalar_lea.vmem %s20_s24, 512  ;;  %p345_p4 = scmp.lt.s32.totalorder %s20_s24, %s20_s24 }
   0xb   :  { %p341_p3 = scmp.ne.s32.totalorder %s20_s24, %s340_s2  ;;  %p346_p5 = scmp.lt.s32.totalorder %s340_s2, %s340_s2 }
   0xd   :  { %p347_p6 = por %p346_p5, %p345_p4 }
   0xf   :  { %p348_p7 = pnand %p347_p6, %p341_p3 }
  0x11   :  { %351 = shalt.err (!%p348_p7)
}
  0x12   :  { %s355_s8 = smov 64   ;;  %s356_s9 = smov 4  }
  0x13   :  { %25 = dma.hbm_to_vmem [thread:$0]  %s446_s0, 512, %s20_s24, [#allocation4], %s355_s8, %s355_s8, %s356_s9  }
  0x14   :  { %352 = dma.done.wait [#allocation4], 512  }
  0x15   :  { %353 = vsyncadd [#allocation4], 4294966784  ;;  %v305_v1 = vld [vmem:[#allocation3 + $0x8] sm:$0xff]   ;;  %v285_v2 = vld [vmem:[%s447_s1] ss:$0 sm:$0xff]  ;;  %vm70_vm0 = vcmask 261120   ;;  %v116_v33 = vlaneseq }
  0x16   :  { %v290_v3 = vld [vmem:[#allocation3] sm:$0xff]   ;;  %v295_v4 = vunpack.c.l.bf16 %v305_v1  ;;  %v296_v6 = vunpack.c.h.bf16 %v305_v1  ;;  %v306_v8 = vld [vmem:[#allocation3 + $0x10] sm:$0xff]   ;;  %v95_v11 = vld [vmem:[#allocation2] sm:$0x1]  ;;  %vm166_vm1 = vcmask 64512   ;;  %vm150_vm2 = vcmask 1041409  }
  0x17   :  { %v291_v5 = vunpack.c.l.bf16 %v290_v3  ;;  %v292_v7 = vunpack.c.h.bf16 %v290_v3  ;;  %v300_v9 = vunpack.c.h.bf16 %v306_v8  ;;  %v299_v10 = vunpack.c.l.bf16 %v306_v8  ;;  %v307_v16 = vld [vmem:[#allocation3 + $0x18] sm:$0xff]   ;;  %315 = vpush %v95_v11 }
  0x18   :  { %v64_v12 = vmul.f32 %v295_v4, %v285_v2  ;;  %v65_v14 = vmul.f32 %v296_v6, %v285_v2  ;;  %v304_v19 = vunpack.c.h.bf16 %v307_v16  ;;  %v303_v20 = vunpack.c.l.bf16 %v307_v16  ;;  %v423_v31 = vld [vmem:[%s451_s5] sm:$0xff] }
  0x19   :  { %v62_v13 = vmul.f32 %v291_v5, %v285_v2  ;;  %v63_v15 = vmul.f32 %v292_v7, %v285_v2  ;;  %v67_v23 = vmul.f32 %v300_v9, %v285_v2  ;;  %v66_v24 = vmul.f32 %v299_v10, %v285_v2  ;;  %v287_v0 = vld [vmem:[%s450_s4] ss:$0 sm:$0xff] }
  0x1a   :  { %v77_v17 = vsel %vm70_vm0, %v64_v12, 0.0  ;;  %v80_v21 = vsel %vm70_vm0, %v65_v14, 0.0  ;;  %v69_v27 = vmul.f32 %v304_v19, %v285_v2  ;;  %v68_v28 = vmul.f32 %v303_v20, %v285_v2  ;;  %v173_v16 = vld [vmem:[%s449_s3] sm:$0xff] }
  0x1b   :  { %v71_v18 = vsel %vm70_vm0, %v62_v13, 0.0  ;;  %78 = vadd.xlane.f32.xlu1 %v77_v17  ;;  %v74_v22 = vsel %vm70_vm0, %v63_v15, 0.0  ;;  %v86_v25 = vsel %vm70_vm0, %v67_v23, 0.0  ;;  %v83_v26 = vsel %vm70_vm0, %v66_v24, 0.0 }
  0x1c   :  { %72 = vadd.xlane.f32.xlu0 %v71_v18  ;;  %v92_v29 = vsel %vm70_vm0, %v69_v27, 0.0  ;;  %v89_v30 = vsel %vm70_vm0, %v68_v28, 0.0  ;;  %v250_v32 = vsel %vm166_vm1, %v423_v31, 0.0  ;;  %v117_v34 = vand.u32 127, %v116_v33 }
  0x1d   :  { %v119_v35 = vshrl.u32 %v116_v33, 7  ;;  %vm152_vm3 = vcmask 1042434   ;;  %vm154_vm4 = vcmask 1043459   ;;  %vm156_vm5 = vcmask 1044484  }
  0x1e   :  { %vm158_vm6 = vcmask 1045509   ;;  %vm160_vm7 = vcmask 1046534   ;;  %vm162_vm8 = vcmask 1047559   ;;  %vm107_vm9 = vcmp.gt.f32.partialorder %v423_v31, 0.0 }
  0x1f   :  { %81 = vadd.xlane.f32.xlu1 %v80_v21  ;;  %v120_v39 = vsub.s32 %v117_v34, %v119_v35  ;;  %v357_v17 = vmov 0.0   ;;  %vm358_vm10 = vmmov 0   ;;  %vm278_vm11 = vcmask 7168  }
  0x20   :  { %75 = vadd.xlane.f32.xlu0 %v74_v22  ;;  %310 = vmatprep.subr.mxu0 %v357_v17 }
  0x21   :  { %312 = vmatprep.mubr.msk.f32.mxu0 %vm358_vm10, %v357_v17  ;;  %311 = vmatpush3.msra.mxu0 %v173_v16 }
  0x23   :  { %87 = vadd.xlane.f32.xlu1 %v86_v25 }
  0x24   :  { %84 = vadd.xlane.f32.xlu0 %v83_v26 }
  0x27   :  { %93 = vadd.xlane.f32.xlu1 %v92_v29 }
  0x28   :  { %90 = vadd.xlane.f32.xlu0 %v89_v30 }
  0x2b   :  { %251 = vadd.xlane.f32.xlu1 %v250_v32 }
  0x48   :  { %s316_s14 = spop %315 }
  0x49   :  { %v97_v36 = vstv %s316_s14 }
  0xa8   :  { %v79_v37 = vpop.xlane.xlu1 %78 }
  0xa9   :  { %v73_v38 = vpop.xlane.xlu0 %72  ;;  %v100_v41 = vadd.f32 %v97_v36, %v79_v37 }
  0xaa   :  { %v98_v40 = vadd.f32 %v97_v36, %v73_v38 }
  0xab   :  { %v129_v49 = vrot.slane %v100_v41, %v120_v39 }
  0xac   :  { %v82_v42 = vpop.xlane.xlu1 %81  ;;  %v121_v46 = vrot.slane %v98_v40, %v120_v39 }
  0xad   :  { %v76_v43 = vpop.xlane.xlu0 %75  ;;  %v101_v44 = vadd.f32 %v97_v36, %v82_v42 }
  0xae   :  { %v99_v45 = vadd.f32 %v97_v36, %v76_v43 }
  0xaf   :  { %v133_v47 = vrot.slane %v101_v44, %v120_v39 }
  0xb0   :  { %v125_v48 = vrot.slane %v99_v45, %v120_v39  ;;  %v88_v50 = vpop.xlane.xlu1 %87 }
  0xb1   :  { %v85_v51 = vpop.xlane.xlu0 %84  ;;  %v103_v53 = vadd.f32 %v97_v36, %v88_v50 }
  0xb2   :  { %v151_v52 = vsel %vm150_vm2, %v125_v48, %v121_v46  ;;  %v102_v54 = vadd.f32 %v97_v36, %v85_v51 }
  0xb3   :  { %v153_v55 = vsel %vm152_vm3, %v129_v49, %v151_v52  ;;  %v141_v58 = vrot.slane %v103_v53, %v120_v39 }
  0xb4   :  { %v155_v56 = vsel %vm154_vm4, %v133_v47, %v153_v55  ;;  %v137_v57 = vrot.slane %v102_v54, %v120_v39  ;;  %v94_v59 = vpop.xlane.xlu1 %93 }
  0xb5   :  { %v91_v60 = vpop.xlane.xlu0 %90  ;;  %v105_v62 = vadd.f32 %v97_v36, %v94_v59 }
  0xb6   :  { %v157_v61 = vsel %vm156_vm5, %v137_v57, %v155_v56  ;;  %v104_v63 = vadd.f32 %v97_v36, %v91_v60 }
  0xb7   :  { %v149_v1 = vrot.slane %v105_v62, %v120_v39  ;;  %v159_v3 = vsel %vm158_vm6, %v141_v58, %v157_v61 }
  0xb8   :  { %v145_v2 = vrot.slane %v104_v63, %v120_v39  ;;  %v252_v4 = vpop.xlane.xlu1 %251 }
  0xb9   :  { %v260_v6 = vsub.f32 %v252_v4, %v287_v0 }
  0xba   :  { %v161_v5 = vsel %vm160_vm7, %v145_v2, %v159_v3 }
  0xbb   :  { %v163_v7 = vsel %vm162_vm8, %v149_v1, %v161_v5  ;;  %v261_v9 = vmul.f32 0.6931472, %v260_v6 }
  0xbc   :  { %v165_v8 = vsel %vm107_vm9, %v163_v7, 1e-16 }
  0xbd   :  { %v167_v10 = vsel %vm166_vm1, %v165_v8, -inf  ;;  %v262_v11 = vmul.f32 1.442695, %v261_v9 }
  0xbe   :  { %168 = vmax.xlane.f32.xlu0 %v167_v10 }
  0xbf   :  { %322 = vpow2.f32 %v262_v11 }
  0xc9   :  { %v323_v12 = vpop.eup %322 }
  0xca   :  { %v288_v13 = vadd.f32 -1.0, %v323_v12 }
  0xcc   :  { %v265_v14 = vmul.f32 %v288_v13, %v423_v31 }
  0xce   :  { %v266_v15 = vsel %vm166_vm1, %v265_v14, 0.0 }
  0xcf   :  { %267 = vadd.xlane.f32.xlu0 %v266_v15 }
 0x14b   :  { %v169_v18 = vpop.xlane.xlu0 %168 }
 0x14c   :  { %v170_v19 = vsub.f32 %v165_v8, %v169_v18 }
 0x14e   :  { %v171_v20 = vmul.f32 1.442695, %v170_v19 }
 0x150   :  { %324 = vpow2.f32 %v171_v20 }
 0x15a   :  { %v325_v21 = vpop.eup %324 }
 0x15b   :  { %313 = vmatmul.mubr.msk.f32.vlgmr.msra.gmra.mrb[0].mxu0 %vm166_vm1, %v325_v21 }
 0x15c   :  { %v268_v22 = vpop.xlane.xlu0 %267 }
 0x15d   :  { %v269_v23 = vadd.f32 1e-10, %v268_v22 }
 0x15f   :  { %326 = vrcp.f32 %v269_v23 }
 0x169   :  { %v327_v27 = vpop.eup %326 }
 0x16a   :  { %v271_v32 = vmul.f32 %v327_v27, %v265_v14 }
 0x22e   :  { %v243_v24 = vpop.f32.mrb[0].mxu0 }
 0x22f   :  { %v244_v25 = vadd.f32 1e-10, %v243_v24  ;;  %v314_v26 = vpop.f32.mrb[1].mxu0 }
 0x231   :  { %328 = vlog2.f32 %v244_v25 }
 0x23b   :  { %v329_v28 = vpop.eup %328 }
 0x23c   :  { %v248_v29 = vmul.f32 0.6931472, %v329_v28 }
 0x23e   :  { %v249_v30 = vsub.f32 %v170_v19, %v248_v29 }
 0x240   :  { %v272_v33 = vmul.f32 %v271_v32, %v249_v30 }
 0x242   :  { %v273_v34 = vsel %vm107_vm9, %v272_v33, 0.0 }
 0x243   :  { %v274_v35 = vsel %vm166_vm1, %v273_v34, 0.0 }
 0x244   :  { %275 = vadd.xlane.f32.xlu1 %v274_v35 }
 0x2d1   :  { %v276_v36 = vpop.xlane.xlu1 %275 }
 0x2d2   :  { %v277_v37 = vsub.f32 0.0, %v276_v36 }
 0x2d4   :  { %279 = vst.msk [vmem:[%s452_s6] sm:$0xff] %vm278_vm11, %v277_v37 }
 0x2d5   :  { %284 = vsyncpa [#allocation4], 1 }

</bundles_post_ra>
